<compile_context>
chip_gen: v5e
topology: v5e:2x2
jax: 0.10.0
libtpu: 0.0.40
codegen_flags: <defaults>
</compile_context>

<pallas_src>
import math

import jax
import jax.numpy as jnp
from jax.experimental import pallas as pl
from jax.experimental.pallas import tpu as pltpu


def _feature_weighting_kernel(x_ref, w_ref, o_ref):
    # (row_tile, feat_tile) * (1, feat_tile) broadcast multiply on the VPU.
    # Any dtype promotion (e.g. bf16 * f32) happens in-register; the store
    # casts to the (promoted) output dtype.
    o_ref[...] = (x_ref[...] * w_ref[...]).astype(o_ref.dtype)


def _round_down(x: int, m: int) -> int:
    return (x // m) * m


def _round_up(x: int, m: int) -> int:
    return ((x + m - 1) // m) * m


def _tpu_budgets():
    """Return (block_budget_bytes, vmem_limit_bytes) tuned per TPU generation."""
    try:
        vmem_cap = pltpu.get_tpu_info().vmem_capacity_bytes
    except Exception:  # API drift / off-TPU tracing -> conservative defaults
        vmem_cap = None
    if vmem_cap is not None and vmem_cap >= (96 << 20):
        # v5e / v6e: 128 MiB physical VMEM -> bigger blocks, fewer grid steps.
        return 6 << 20, 48 << 20
    # v7x (64 MiB per TC) or unknown: conservative.
    return 4 << 20, 32 << 20


def _weighted_2d(x2d, w_row, out_dtype, *, block_bytes, vmem_limit_bytes):
    """y[r, c] = x2d[r, c] * w_row[0, c] as a single pallas_call."""
    R, C = x2d.shape
    in_item = jnp.dtype(x2d.dtype).itemsize
    out_item = jnp.dtype(out_dtype).itemsize
    w_item = jnp.dtype(w_row.dtype).itemsize
    # Sublane packing of the most tightly packed streamed operand.
    pack = max(8, 32 // in_item, 32 // out_item)
    bytes_per_elem = in_item + out_item          # streamed in + streamed out

    # --- Feature tile: whole axis whenever a pack-row stripe fits the budget
    # (contiguous slab DMAs, weight always resident).  Otherwise the largest
    # 128-multiple tile, preferring one that divides C (no masked last block).
    if C * bytes_per_elem * pack <= 2 * block_bytes:
        feat_tile = C
    elif C >= 128:
        cap_elems = (2 * block_bytes) // (bytes_per_elem * pack)
        cap = max(128, _round_down(min(C, cap_elems), 128))
        feat_tile = 128
        d = 128
        while d <= cap:
            if C % d == 0:
                feat_tile = d
            d += 128
        if C % 128 != 0:
            feat_tile = cap      # rare: huge non-128-multiple feature axis
    else:
        feat_tile = C

    # --- Row tile: fill the block budget, sublane-pack aligned.
    if R < pack:
        row_tile = R
    else:
        budget_rows = max(pack,
                          (2 * block_bytes) // max(1, feat_tile * bytes_per_elem))
        row_tile = min(_round_down(budget_rows, pack), _round_down(R, pack))
        row_tile = max(row_tile, pack)

    n_feat = pl.cdiv(C, feat_tile)
    n_row = pl.cdiv(R, row_tile)
    # v7x has 2 TensorCores: make sure a non-trivial tensor exposes >= 2
    # parallel blocks so both cores stream from HBM.
    if n_feat * n_row == 1 and R >= 2 * pack:
        row_tile = _round_up(pl.cdiv(R, 2), pack)
        n_row = pl.cdiv(R, row_tile)

    cost = pl.CostEstimate(
        flops=R * C,
        transcendentals=0,
        bytes_accessed=R * C * bytes_per_elem + C * w_item,
    )

    return pl.pallas_call(
        _feature_weighting_kernel,
        out_shape=jax.ShapeDtypeStruct((R, C), out_dtype),
        grid_spec=pltpu.PrefetchScalarGridSpec(
            num_scalar_prefetch=0,
            # Feature axis outermost: the weight's block index (0, j) only
            # changes with the outer axis, so it stays resident across the
            # whole inner row loop.
            grid=(n_feat, n_row),
            in_specs=[
                pl.BlockSpec((row_tile, feat_tile), lambda j, i: (i, j)),
                pl.BlockSpec((1, feat_tile), lambda j, i: (0, j)),
            ],
            out_specs=pl.BlockSpec((row_tile, feat_tile), lambda j, i: (i, j)),
        ),
        compiler_params=pltpu.CompilerParams(
            dimension_semantics=("parallel", "parallel"),
            vmem_limit_bytes=vmem_limit_bytes,
        ),
        cost_estimate=cost,
    )(x2d, w_row)


def feature_weighting(inputs: jax.Array, weighting: jax.Array) -> jax.Array:
    """y = inputs * weighting (weighting broadcast along the last dim)."""
    orig_shape = inputs.shape
    F = orig_shape[-1]
    assert weighting.shape == (F,)
    out_dtype = jnp.promote_types(inputs.dtype, weighting.dtype)

    rows = math.prod(orig_shape[:-1])
    if rows == 0 or F == 0:
        # Fresh (empty) output with the promoted dtype.
        return (inputs * weighting).astype(out_dtype)

    block_bytes, vmem_limit = _tpu_budgets()
    kw = dict(block_bytes=block_bytes, vmem_limit_bytes=vmem_limit)
    x2d = inputs.reshape(rows, F)

    if F % 128 == 0:
        out2d = _weighted_2d(x2d, weighting.reshape(1, F), out_dtype, **kw)
        return out2d.reshape(orig_shape).astype(out_dtype)

    # Lane-density: fold k rows into the lane axis so the folded last dim is a
    # multiple of 128 (unmasked vst); the weight pattern simply repeats.
    k = 128 // math.gcd(F, 128)
    rows_bulk = _round_down(rows, k)

    if rows_bulk == 0:
        # Tiny tensor (< k rows): masked sub-128 stores are negligible here.
        out2d = _weighted_2d(x2d, weighting.reshape(1, F), out_dtype, **kw)
        return out2d.reshape(orig_shape)

    w_folded = jnp.tile(weighting, k).reshape(1, F * k)   # only built when folding

    if rows_bulk == rows:
        out2d = _weighted_2d(x2d.reshape(rows // k, F * k), w_folded,
                             out_dtype, **kw)
        return out2d.reshape(orig_shape)

    # Bulk rows go through the lane-dense folded kernel; the (< k)-row tail
    # runs unfolded.  TODO(synk): the slice/concat costs an extra pass over
    # the data; still far cheaper than masked sub-128-lane stores on the bulk.
    bulk = _weighted_2d(
        x2d[:rows_bulk].reshape(rows_bulk // k, F * k), w_folded, out_dtype, **kw
    ).reshape(rows_bulk, F)
    tail = _weighted_2d(x2d[rows_bulk:], weighting.reshape(1, F), out_dtype, **kw)
    out2d = jnp.concatenate([bulk, tail], axis=0)
    return out2d.reshape(orig_shape)


class FeatureWeighting:
    """JAX/Pallas port of the PyTorch FeatureWeighting module."""

    def __init__(self, in_features: int, weight_init=jnp.ones):
        self.in_features = in_features
        # Deterministic init matching nn.init.ones_ (the module default).
        self.weighting = weight_init(in_features, dtype=jnp.float32)

    def __call__(self, inputs: jax.Array) -> jax.Array:
        return feature_weighting(inputs, self.weighting)


if __name__ == "__main__":
    key = jax.random.PRNGKey(0)
    batch, seq, in_features = 2, 8, 32   # inputs: (batch, seq, in_features)

    x = jax.random.normal(key, (batch, seq, in_features), dtype=jnp.float32)

    # Default ones_ init (fold path: F=32 -> 128 lanes, rows divisible by k).
    module = FeatureWeighting(in_features)
    y = jax.block_until_ready(module(x))
    ref = x * module.weighting
    assert y.shape == x.shape and y.dtype == jnp.float32
    assert jnp.allclose(y, ref, atol=1e-6, rtol=1e-6)

    # Non-trivial deterministic weighting.
    module2 = FeatureWeighting(
        in_features,
        weight_init=lambda n, dtype=jnp.float32: (
            jnp.arange(1, n + 1, dtype=dtype) / n),
    )
    y2 = jax.block_until_ready(module2(x))
    assert jnp.allclose(y2, x * module2.weighting, atol=1e-6, rtol=1e-6)

    # Rows not divisible by the fold factor -> folded bulk + tiny unfolded tail.
    x3 = jax.random.normal(jax.random.PRNGKey(1), (3, 7, 32), dtype=jnp.float32)
    m3 = FeatureWeighting(
        32,
        weight_init=lambda n, dtype=jnp.float32: (
            jnp.arange(n, dtype=dtype) * 0.5 - 1.0),
    )
    y3 = jax.block_until_ready(m3(x3))
    assert jnp.allclose(y3, x3 * m3.weighting, atol=1e-6, rtol=1e-6)

    # Feature dim already a multiple of 128 -> lane-dense without folding,
    # row axis split into >= 2 blocks for megacore.
    x4 = jax.random.normal(jax.random.PRNGKey(2), (4, 6, 128), dtype=jnp.float32)
    m4 = FeatureWeighting(
        128,
        weight_init=lambda n, dtype=jnp.float32: (
            jnp.arange(1, n + 1, dtype=dtype) / n),
    )
    y4 = jax.block_until_ready(m4(x4))
    assert jnp.allclose(y4, x4 * m4.weighting, atol=1e-6, rtol=1e-6)

    # Mixed precision: bf16 inputs * f32 weights -> promoted f32 output
    # (matches the PyTorch float32-parameter module).
    xb = x.astype(jnp.bfloat16)
    yb = jax.block_until_ready(module2(xb))
    assert yb.dtype == jnp.float32
    assert jnp.allclose(yb, xb * module2.weighting, atol=1e-5, rtol=1e-5)

    print("KERNEL_OK")
</pallas_src>

<mosaic_0001>
module attributes {stable_mosaic.version = 11 : i64} {
  func.func @_feature_weighting_kernel(%arg0: i32, %arg1: i32, %arg2: memref<4x128xf32, #tpu.memory_space<vmem>>, %arg3: memref<1x128xf32, #tpu.memory_space<vmem>>, %arg4: memref<4x128xf32, #tpu.memory_space<vmem>>) attributes {dimension_semantics = [#tpu.dimension_semantics<parallel>, #tpu.dimension_semantics<parallel>], iteration_bounds = array<i64: 1, 1>, scalar_prefetch = 0 : i64, scratch_operands = 0 : i64, tpu.core_type = #tpu.core_type<tc>, window_params = [{transform_indices = @transform_0, window_bounds = array<i64: 4, 128>}, {transform_indices = @transform_1, window_bounds = array<i64: 1, 128>}, {transform_indices = @transform_2, window_bounds = array<i64: 4, 128>}]} {
    %c0 = arith.constant 0 : index
    %c0_0 = arith.constant 0 : index
    %0 = vector.load %arg2[%c0, %c0_0] : memref<4x128xf32, #tpu.memory_space<vmem>>, vector<4x128xf32>
    %c0_1 = arith.constant 0 : index
    %c0_2 = arith.constant 0 : index
    %1 = vector.load %arg3[%c0_1, %c0_2] : memref<1x128xf32, #tpu.memory_space<vmem>>, vector<1x128xf32>
    %2 = vector.broadcast %1 : vector<1x128xf32> to vector<4x128xf32>
    %3 = arith.mulf %0, %2 : vector<4x128xf32>
    %c0_3 = arith.constant 0 : index
    %c0_4 = arith.constant 0 : index
    %4 = vector.load %arg4[%c0_3, %c0_4] : memref<4x128xf32, #tpu.memory_space<vmem>>, vector<4x128xf32>
    tpu.vector_store %arg4[%c0_3, %c0_4], %3 {strides = array<i32>} : memref<4x128xf32, #tpu.memory_space<vmem>>, vector<4x128xf32>,
    return
  }
  func.func @transform_0(%arg0: i32, %arg1: i32) -> (i32, i32) {
    %c0_i32 = arith.constant 0 : i32
    return %arg1, %arg0 : i32, i32
  }
  func.func @transform_1(%arg0: i32, %arg1: i32) -> (i32, i32) {
    %c0_i32 = arith.constant 0 : i32
    %c0_i32_0 = arith.constant 0 : i32
    return %c0_i32, %arg0 : i32, i32
  }
  func.func @transform_2(%arg0: i32, %arg1: i32) -> (i32, i32) {
    %c0_i32 = arith.constant 0 : i32
    return %arg1, %arg0 : i32, i32
  }
}

</mosaic_0001>

<bundles_post_ra>
// kernel: tpu_custom_call.1
= control target key start
LH: loop header
LB: loop body
LE: loop exit
PB: predicated region body
PF: predicated region fallthrough
CT: control target
= control target key end

     0   :  { %7 = vsyncpa [#allocation3], 0  ;;  %s174_s0 = inlined_call_operand.hbm [shape: f32[4,128], index: 0, kind: input, shape index: {}]   ;;  %s175_s1 = inlined_call_operand.hbm [shape: f32[1,128], index: 1, kind: input, shape index: {}]   ;;  %s176_s2 = inlined_call_operand.hbm [shape: f32[4,128], index: 2, kind: output, shape index: {}]  }
   0x1   :  { %8 = vsyncpa [#allocation6], 0 }
   0x2   :  { %9 = vsyncpa [#allocation4], 0  ;;  %s15_s11 = sshll.u32 %s174_s0, 4  ;;  %s147_s12 = smov [#allocation2]   ;;  %s16_s11 = int_to_ptr.hbm [resolvable:$true] %s15_s11 }
   0x3   :  { %s17_s13 = sshll.u32 %s147_s12, 4  ;;  %s26_s16 = sshll.u32 %s175_s1, 4  ;;  %s18_s13 = int_to_ptr.vmem [resolvable:$true] %s17_s13  ;;  %s27_s16 = int_to_ptr.hbm [resolvable:$true] %s26_s16 }
   0x4   :  { %20 = dma.hbm_to_vmem [thread:$0]  %s16_s11, 64, %s18_s13, [#allocation3]  }
   0x5   :  { %s148_s17 = smov [#allocation5]  }
   0x6   :  { %s28_s18 = sshll.u32 %s148_s17, 4  ;;  %s29_s18 = int_to_ptr.vmem [resolvable:$true] %s28_s18 }
   0x7   :  { %31 = dma.hbm_to_vmem [thread:$0]  %s27_s16, 16, %s29_s18, [#allocation6]  }
   0x8   :  { %141 = dma.done.wait [#allocation3], 64  }
   0x9   :  { %142 = vsyncadd [#allocation3], 4294967232 }
   0xa   :  { %143 = dma.done.wait [#allocation6], 16  }
   0xb   :  { %144 = vsyncadd [#allocation6], 4294967280  ;;  %s149_s19 = smov [#allocation7]   ;;  %s54_s22 = sshll.u32 %s176_s2, 4  ;;  %v40_v0 = vld [vmem:[#allocation2] sm:$0xf]  ;;  %s55_s22 = int_to_ptr.hbm [resolvable:$true] %s54_s22 }
   0xc   :  { %s52_s0 = sshll.u32 %s149_s19, 4  ;;  %v68_v1 = vld [vmem:[#allocation5] ss:$0 sm:$0xff]  ;;  %s53_s0 = int_to_ptr.vmem [resolvable:$true] %s52_s0 }
   0xd   :  { %v45_v2 = vmul.f32 %v68_v1, %v40_v0 }
   0xf   :  { %46 = vst [vmem:[#allocation7] sm:$0xf] %v45_v2 }
  0x10   :  { %57 = dma.vmem_to_hbm [thread:$0]  %s53_s0, 64, %s55_s22, [#allocation4]  }
  0x11   :  { %145 = dma.done.wait [#allocation4], 64  }
  0x12   :  { %146 = vsyncadd [#allocation4], 4294967232 }
  0x13   :  { %62 = vsyncpa [#allocation3], 1 }
  0x14   :  { %63 = vsyncpa [#allocation6], 1 }
  0x15   :  { %64 = vsyncpa [#allocation4], 1 }

</bundles_post_ra>
